<compile_context>
chip_gen: v7x
topology: tpu7x:2x2x1
jax: 0.10.0
libtpu: 0.0.40
codegen_flags: <defaults>
</compile_context>

<pallas_src>
import math

import jax
import jax.numpy as jnp
import numpy as np
from jax.experimental import pallas as pl
from jax.experimental.pallas import tpu as pltpu


def _pool_out_dim(L, K, S):
    # PyTorch ceil_mode output-size formula (padding=0, dilation=1).
    o = math.ceil((L - K) / S) + 1
    # PyTorch rule: the last pooling window must start inside the input.
    if (o - 1) * S >= L:
        o -= 1
    return o


def maxpool2d_ceil(x, kernel_size=3):
    """Equivalent of nn.MaxPool2d(kernel_size, stride=kernel_size, ceil_mode=True),
    NCHW in / NCHW out."""
    N, C, H, W = x.shape
    K = S = kernel_size  # PyTorch default: stride = kernel_size
    H_out = _pool_out_dim(H, K, S)
    W_out = _pool_out_dim(W, K, S)
    NC = N * C

    # Max-identity fill for the ceil_mode padding.
    if jnp.issubdtype(x.dtype, jnp.floating):
        fill = float("-inf")
    else:
        fill = int(jnp.iinfo(x.dtype).min)

    # NCHW -> (H, W, N*C): lane-dense layout (N*C on the 128-lane axis).
    xt = jnp.transpose(x, (2, 3, 0, 1)).reshape(H, W, NC)

    # Pad spatial dims so every clipped window is a full KxK window, and pad
    # the lane axis up to a multiple of 128.
    LANE = 128
    Hp, Wp = H_out * K, W_out * K
    NCp = ((NC + LANE - 1) // LANE) * LANE
    xt = jnp.pad(xt, ((0, Hp - H), (0, Wp - W), (0, NCp - NC)),
                 constant_values=fill)

    # Stride == kernel_size  =>  non-overlapping windows  =>  the window tensor
    # is a pure permutation (no replication). XLA fuses these shape ops with
    # the transpose/pad above into one copy.
    xw = (xt.reshape(H_out, K, W_out, K, NCp)
            .transpose(0, 2, 1, 3, 4)
            .reshape(H_out, W_out, K * K, NCp))

    # Lane-tile selection: widest of {512, 256, 128} dividing NCp, capped so a
    # double-buffered (in + out) block set stays well under every TPU gen's
    # scoped VMEM default (v5e 16 MiB, v7x 32 MiB).
    itemsize = jnp.dtype(x.dtype).itemsize
    lane_tile = LANE
    for cand in (512, 256):
        if NCp % cand == 0:
            lane_tile = cand
            break

    def _block_bytes(t):
        return (H_out * W_out * K * K + H_out * W_out) * t * itemsize

    while lane_tile > LANE and 2 * _block_bytes(lane_tile) > (8 << 20):
        lane_tile //= 2

    grid = (NCp // lane_tile,)

    def kernel(x_ref, o_ref):
        # One sublane-axis max reduction over the K*K window elements and one
        # full-width, unmasked store of the whole output tile.
        o_ref[...] = jnp.max(x_ref[...], axis=2)

    out = pl.pallas_call(
        kernel,
        out_shape=jax.ShapeDtypeStruct((H_out, W_out, NCp), x.dtype),
        grid=grid,
        in_specs=[pl.BlockSpec((H_out, W_out, K * K, lane_tile),
                               lambda i: (0, 0, 0, i))],
        out_specs=pl.BlockSpec((H_out, W_out, lane_tile),
                               lambda i: (0, 0, i)),
        compiler_params=pltpu.CompilerParams(
            dimension_semantics=("parallel",)),
    )(xw)

    # (H_out, W_out, NCp) -> strip lane padding -> NCHW.
    out = out[:, :, :NC].reshape(H_out, W_out, N, C)
    return jnp.transpose(out, (2, 3, 0, 1))


def _reference_maxpool(x_np, kernel_size=3):
    """NumPy reference with PyTorch ceil_mode semantics (for verification)."""
    N, C, H, W = x_np.shape
    K = S = kernel_size
    H_out = _pool_out_dim(H, K, S)
    W_out = _pool_out_dim(W, K, S)
    out = np.empty((N, C, H_out, W_out), dtype=x_np.dtype)
    for oh in range(H_out):
        h0, h1 = oh * S, min(oh * S + K, H)
        for ow in range(W_out):
            w0, w1 = ow * S, min(ow * S + K, W)
            out[:, :, oh, ow] = x_np[:, :, h0:h1, w0:w1].max(axis=(2, 3))
    return out


if __name__ == "__main__":
    key = jax.random.PRNGKey(0)
    k1, k2 = jax.random.split(key)

    # Matches the script's `torch.reshape(input, (-1, 1, 5, 5))`: N=2, C=1, 5x5.
    x1 = jax.random.normal(k1, (2, 1, 5, 5), dtype=jnp.float32)
    y1 = jax.block_until_ready(maxpool2d_ceil(x1, kernel_size=3))
    assert y1.shape == (2, 1, 2, 2), y1.shape
    np.testing.assert_array_equal(np.asarray(y1),
                                  _reference_maxpool(np.asarray(x1), 3))

    # Larger case: exercises ceil_mode clipping, lane padding and a >1 grid
    # (NC = 320 -> NCp = 384 -> 3 lane tiles of 128).
    x2 = jax.random.normal(k2, (2, 160, 10, 10), dtype=jnp.float32)
    y2 = jax.block_until_ready(maxpool2d_ceil(x2, kernel_size=3))
    assert y2.shape == (2, 160, 4, 4), y2.shape
    np.testing.assert_array_equal(np.asarray(y2),
                                  _reference_maxpool(np.asarray(x2), 3))

    print("KERNEL_OK")
</pallas_src>

<mosaic_0001>
module attributes {stable_mosaic.version = 11 : i64} {
  func.func @kernel(%arg0: i32, %arg1: memref<2x2x9x128xf32, #tpu.memory_space<vmem>>, %arg2: memref<2x2x128xf32, #tpu.memory_space<vmem>>) attributes {dimension_semantics = [#tpu.dimension_semantics<parallel>], iteration_bounds = array<i64: 1>, scalar_prefetch = 0 : i64, scratch_operands = 0 : i64, tpu.core_type = #tpu.core_type<tc>, window_params = [{transform_indices = @transform_0, window_bounds = array<i64: 2, 2, 9, 128>}, {transform_indices = @transform_1, window_bounds = array<i64: 2, 2, 128>}]} {
    %c0 = arith.constant 0 : index
    %c0_0 = arith.constant 0 : index
    %c0_1 = arith.constant 0 : index
    %c0_2 = arith.constant 0 : index
    %0 = vector.load %arg1[%c0, %c0_0, %c0_1, %c0_2] : memref<2x2x9x128xf32, #tpu.memory_space<vmem>>, vector<2x2x9x128xf32>
    %cst = arith.constant dense<0xFF800000> : vector<2x2x128xf32>
    %1 = vector.multi_reduction <maximumf>, %0, %cst [2] : vector<2x2x9x128xf32> to vector<2x2x128xf32>
    %c0_3 = arith.constant 0 : index
    %c0_4 = arith.constant 0 : index
    %c0_5 = arith.constant 0 : index
    %2 = vector.load %arg2[%c0_3, %c0_4, %c0_5] : memref<2x2x128xf32, #tpu.memory_space<vmem>>, vector<2x2x128xf32>
    tpu.vector_store %arg2[%c0_3, %c0_4, %c0_5], %1 {strides = array<i32>} : memref<2x2x128xf32, #tpu.memory_space<vmem>>, vector<2x2x128xf32>,
    return
  }
  func.func @transform_0(%arg0: i32) -> (i32, i32, i32, i32) {
    %c0_i32 = arith.constant 0 : i32
    %c0_i32_0 = arith.constant 0 : i32
    %c0_i32_1 = arith.constant 0 : i32
    %c0_i32_2 = arith.constant 0 : i32
    return %c0_i32, %c0_i32_0, %c0_i32_1, %arg0 : i32, i32, i32, i32
  }
  func.func @transform_1(%arg0: i32) -> (i32, i32, i32) {
    %c0_i32 = arith.constant 0 : i32
    %c0_i32_0 = arith.constant 0 : i32
    %c0_i32_1 = arith.constant 0 : i32
    return %c0_i32, %c0_i32_0, %arg0 : i32, i32, i32
  }
}

</mosaic_0001>

<bundles_post_ra>
// kernel: tpu_custom_call.1
= control target key start
LH: loop header
LB: loop body
LE: loop exit
PB: predicated region body
PF: predicated region fallthrough
CT: control target
= control target key end

     0   :  { %vm17_vm0 = vcmask 1040384   ;;  %s153_s0 = inlined_call_operand.vmem [shape: f32[2,2,9,128], index: 0, kind: input, shape index: {}]   ;;  %s154_s1 = inlined_call_operand.hbm [shape: f32[2,2,128], index: 1, kind: output, shape index: {}]  }
   0x1   :  { %v9_v0 = vld [vmem:[%s153_s0] sm:$0xff]  ;;  %v10_v1 = vld [vmem:[%s153_s0 + $0x8] sm:$0x1]  ;;  %v11_v2 = vld [vmem:[%s153_s0 + $0x10] sm:$0xff] }
   0x2   :  { %v12_v3 = vld [vmem:[%s153_s0 + $0x18] sm:$0x1]  ;;  %v18_v4 = vsel %vm17_vm0, %v10_v1, -inf  ;;  %v13_v5 = vld [vmem:[%s153_s0 + $0x20] sm:$0xff]  ;;  %v14_v6 = vld [vmem:[%s153_s0 + $0x28] sm:$0x1] }
   0x3   :  { %v19_v7 = vmax.f32 %v9_v0, %v18_v4  ;;  %v26_v8 = vsel %vm17_vm0, %v12_v3, -inf  ;;  %v15_v9 = vld [vmem:[%s153_s0 + $0x30] sm:$0xff]  ;;  %v16_v10 = vld [vmem:[%s153_s0 + $0x38] sm:$0x1]  ;;  %v34_v11 = vsel %vm17_vm0, %v14_v6, -inf }
   0x4   :  { %v27_v12 = vmax.f32 %v11_v2, %v26_v8  ;;  %v35_v13 = vmax.f32 %v13_v5, %v34_v11  ;;  %v42_v14 = vsel %vm17_vm0, %v16_v10, -inf }
   0x5   :  { %6 = vsyncpa [#allocation3], 0  ;;  %v20_v15 = vrot.slane %v19_v7, 4  ;;  %v43_v16 = vmax.f32 %v15_v9, %v42_v14  ;;  %vm54_vm1 = vcmask 1041409   ;;  %s104_s0 = smov [#allocation2]  }
   0x6   :  { %v28_v17 = vrot.slane %v27_v12, 4  ;;  %v36_v18 = vrot.slane %v35_v13, 4  ;;  %s66_s22 = sshll.u32 %s104_s0, 4  ;;  %s67_s22 = int_to_ptr.vmem [resolvable:$true] %s66_s22 }
   0x7   :  { %v21_v19 = vmax.f32 %v19_v7, %v20_v15  ;;  %v44_v20 = vrot.slane %v43_v16, 4  ;;  %s80_s23 = scalar_lea.vmem %s67_s22, 64  ;;  %p85_p1 = scmp.lt.s32.totalorder %s67_s22, %s67_s22 }
   0x8   :  { %v29_v21 = vmax.f32 %v27_v12, %v28_v17  ;;  %v37_v22 = vmax.f32 %v35_v13, %v36_v18  ;;  %p81_p0 = scmp.ne.s32.totalorder %s67_s22, %s80_s23  ;;  %p86_p2 = scmp.lt.s32.totalorder %s80_s23, %s80_s23 }
   0x9   :  { %v22_v23 = vrot.slane %v21_v19, 2  ;;  %v45_v24 = vmax.f32 %v43_v16, %v44_v20 }
   0xa   :  { %v30_v25 = vrot.slane %v29_v21, 2  ;;  %v38_v26 = vrot.slane %v37_v22, 2  ;;  %p87_p3 = por %p86_p2, %p85_p1 }
   0xb   :  { %v23_v27 = vmax.f32 %v21_v19, %v22_v23  ;;  %v46_v28 = vrot.slane %v45_v24, 2 }
   0xc   :  { %v31_v29 = vmax.f32 %v29_v21, %v30_v25  ;;  %v39_v30 = vmax.f32 %v37_v22, %v38_v26  ;;  %p88_p4 = pnand %p87_p3, %p81_p0 }
   0xd   :  { %v24_v31 = vrot.slane %v23_v27, 1  ;;  %v47_v32 = vmax.f32 %v45_v24, %v46_v28 }
   0xe   :  { %v32_v33 = vrot.slane %v31_v29, 1  ;;  %v40_v34 = vrot.slane %v39_v30, 1 }
   0xf   :  { %v25_v35 = vmax.f32 %v23_v27, %v24_v31  ;;  %v48_v36 = vrot.slane %v47_v32, 1 }
  0x10   :  { %v33_v37 = vmax.f32 %v31_v29, %v32_v33  ;;  %v41_v38 = vmax.f32 %v39_v30, %v40_v34 }
  0x11   :  { %v49_v39 = vmax.f32 %v47_v32, %v48_v36 }
  0x12   :  { %v55_v40 = vsel %vm54_vm1, %v33_v37, %v25_v35 }
  0x13   :  { %59 = vst [vmem:[#allocation2] sm:$0x3] %v55_v40  ;;  %v56_v41 = vsel %vm54_vm1, %v49_v39, %v41_v38 }
  0x14   :  { %60 = vst [vmem:[#allocation2 + $0x2] sm:$0x3] %v56_v41 }
  0x15   :  { %91 = shalt.err (!%p88_p4)
}
  0x16   :  { %s92_s26 = scalar_lea.hbm %s154_s1, 64 }
  0x17   :  { %p93_p5 = scmp.ne.s32.totalorder %s154_s1, %s92_s26  ;;  %p96_p6 = scmp.lt.u32.totalorder %s92_s26, %s154_s1 }
  0x19   :  { %p98_p7 = pnand %p96_p6, %p93_p5 }
  0x1b   :  { %101 = shalt.err (!%p98_p7)
}
  0x1c   :  { %s105_s2 = smov 32   ;;  %s106_s3 = smov 2  }
  0x1d   :  { %72 = dma.vmem_to_hbm [thread:$0]  %s67_s22, 64, %s154_s1, [#allocation3], %s105_s2, %s105_s2, %s106_s3  }
  0x1e   :  { %102 = dma.done.wait [#allocation3], 64  }
  0x1f   :  { %103 = vsyncadd [#allocation3], 4294967232 }
  0x20   :  { %76 = vsyncpa [#allocation3], 1 }

</bundles_post_ra>
